<compile_context>
chip_gen: v7x
topology: tpu7x:2x2x1
jax: 0.10.0
libtpu: 0.0.40
codegen_flags: <defaults>
</compile_context>

<pallas_src>
import jax
import jax.numpy as jnp
from jax.experimental import pallas as pl
from jax.experimental.pallas import tpu as pltpu


def _round_up(n, m):
    return ((n + m - 1) // m) * m


def _ratio_kernel(x_ref, thp_ref, w1x_ref, w2_ref, b2_ref, logr_ref):
    # x:    [TB, Dx] f32   (HBM-streamed; bf16 cast below is a free VPU slot)
    # thp:  [TB, H]  f32   (theta @ w1_t + b1, precomputed in the wrapper)
    # w1x:  [Dx, H]  bf16  (resident)
    # w2:   [1, H]   f32   (resident)        b2: [1, 1] f32 (SMEM scalar)
    x_bf16 = x_ref[...].astype(jnp.bfloat16)
    h = jnp.dot(x_bf16, w1x_ref[...], preferred_element_type=jnp.float32)
    h = jnp.maximum(h + thp_ref[...], 0.0)                       # ReLU
    # Second layer (H -> 1): VPU multiply + XLU lane reduction instead of an
    # N=1 MXU matmul.
    logr = jnp.sum(h * w2_ref[...], axis=-1, keepdims=True) + b2_ref[0, 0]
    logr_ref[...] = logr.astype(logr_ref.dtype)


def ratio_estimator_forward(X, theta, params, *, tile_b=2048):
    """Returns (logratio [B,1] float32, preds [B,1] int32)."""
    w1x, w1t, b1, w2_row, b2 = params      # pre-cast / pre-shaped at init time

    B = X.shape[0]
    x_flat = X.reshape(B, -1)              # streamed in native dtype (f32)
    th = theta.reshape(B, -1).astype(jnp.float32)
    Dx = x_flat.shape[1]
    H = b1.shape[1]

    # Tiny theta/b1 path stays in XLA (negligible next to the X stream).
    th_proj = th @ w1t + b1                # [B, H] f32

    # Batch tile: multiple of 8 sublanes; >=2 tiles when possible so v7x's
    # second TensorCore gets work.  Default 2048 keeps the double-buffered f32
    # x tile at 16 MiB (safe for v7x's 64 MiB VMEM); v5e/v6e can use 4096.
    tb = min(tile_b, max(8, _round_up(-(-B // 2), 8)))

    b_eff = B
    if B < 8:
        # Sub-sublane batch: pad to one 8-row tile (a few-KiB copy) so every
        # block is fully in bounds.  Larger batches are never padded: Pallas
        # clamps the ragged last block's DMA and drops its OOB output rows.
        b_eff = 8
        x_flat = jnp.pad(x_flat, ((0, b_eff - B), (0, 0)))
        th_proj = jnp.pad(th_proj, ((0, b_eff - B), (0, 0)))
    n_tiles = pl.cdiv(b_eff, tb)

    # VMEM budget: double-buffered x + th_proj + out tiles, resident weights.
    buf_bytes = 2 * (tb * Dx * 4 + tb * H * 4 + tb * 4) + 2 * Dx * H * 2
    vmem_limit = min(max(32 * 1024 * 1024, int(buf_bytes * 1.5)),
                     100 * 1024 * 1024)

    cost = pl.CostEstimate(
        flops=2 * b_eff * Dx * H + 3 * b_eff * H,
        transcendentals=0,
        bytes_accessed=b_eff * Dx * x_flat.dtype.itemsize
        + b_eff * H * 4 + Dx * H * 2 + H * 4 + b_eff * 4,
    )

    logr = pl.pallas_call(
        _ratio_kernel,
        out_shape=jax.ShapeDtypeStruct((b_eff, 1), jnp.float32),
        grid=(n_tiles,),
        in_specs=[
            pl.BlockSpec((tb, Dx), lambda i: (i, 0)),            # x tile (pipelined)
            pl.BlockSpec((tb, H), lambda i: (i, 0)),             # theta proj tile
            pl.BlockSpec((Dx, H), lambda i: (0, 0)),             # w1_x resident
            pl.BlockSpec((1, H), lambda i: (0, 0)),              # w2 row resident
            pl.BlockSpec(memory_space=pltpu.MemorySpace.SMEM),   # b2 scalar
        ],
        out_specs=pl.BlockSpec((tb, 1), lambda i: (i, 0)),
        compiler_params=pltpu.CompilerParams(
            dimension_semantics=("parallel",),
            vmem_limit_bytes=vmem_limit,
        ),
        cost_estimate=cost,
    )(x_flat, th_proj, w1x, w2_row, b2)

    logr = logr[:B]
    # predict_labels: sigmoid(logr) > 0.5  <=>  logr > 0  (no transcendental).
    # TODO(synk): PyTorch .long() is int64; int32 here (JAX x64 off by default).
    preds = (logr > 0.0).astype(jnp.int32)
    return logr, preds


def init_params(key, dx, dt, hidden):
    """Params pre-cast / pre-shaped once (no per-forward astype/reshape)."""
    k1, k2, k3 = jax.random.split(key, 3)
    din = dx + dt
    w1x = (jax.random.normal(k1, (dx, hidden), jnp.float32)
           / jnp.sqrt(din)).astype(jnp.bfloat16)                 # kernel weight
    w1t = jax.random.normal(k2, (dt, hidden), jnp.float32) / jnp.sqrt(din)
    b1 = jnp.zeros((1, hidden), jnp.float32)
    w2 = jax.random.normal(k3, (1, hidden), jnp.float32) / jnp.sqrt(hidden)
    b2 = jnp.zeros((1, 1), jnp.float32)
    return w1x, w1t, b1, w2, b2


def _reference_forward(X, theta, params):
    w1x, w1t, b1, w2_row, b2 = params
    B = X.shape[0]
    x = X.reshape(B, -1).astype(jnp.float32)
    t = theta.reshape(B, -1).astype(jnp.float32)
    h = jnp.maximum(x @ w1x.astype(jnp.float32) + t @ w1t + b1, 0.0)
    return h @ w2_row.reshape(-1, 1).astype(jnp.float32) + b2


if __name__ == "__main__":
    key = jax.random.PRNGKey(0)
    kx, kt, kp = jax.random.split(key, 3)

    B, C, Himg, Wimg = 2, 4, 16, 16    # small NCHW observation
    Dt = 4                             # parameter (theta) dimension
    HIDDEN = 32

    X = jax.random.normal(kx, (B, C, Himg, Wimg), jnp.float32)
    theta = jax.random.normal(kt, (B, Dt), jnp.float32)

    Dx = C * Himg * Wimg
    params = init_params(kp, Dx, Dt, HIDDEN)

    logr, preds = ratio_estimator_forward(X, theta, params)
    jax.block_until_ready((logr, preds))

    assert logr.shape == (B, 1) and logr.dtype == jnp.float32
    assert preds.shape == (B, 1) and preds.dtype == jnp.int32
    # threshold consistency with the log-ratio sign (predict_labels semantics)
    assert bool(jnp.all((logr > 0.0).astype(jnp.int32) == preds))
    # numerical check against pure-JAX f32 reference (bf16 contraction tolerance)
    ref = _reference_forward(X, theta, params)
    assert bool(jnp.allclose(logr, ref, rtol=5e-2, atol=5e-2))

    print("KERNEL_OK")
</pallas_src>

<mosaic_0001>
module attributes {stable_mosaic.version = 11 : i64} {
  func.func @_ratio_kernel(%arg0: i32, %arg1: memref<8x1024xf32, #tpu.memory_space<vmem>>, %arg2: memref<8x32xf32, #tpu.memory_space<vmem>>, %arg3: memref<1024x32xbf16, #tpu.memory_space<vmem>>, %arg4: memref<1x32xf32, #tpu.memory_space<vmem>>, %arg5: memref<1x1xf32, #tpu.memory_space<smem>>, %arg6: memref<8x1xf32, #tpu.memory_space<vmem>>) attributes {dimension_semantics = [#tpu.dimension_semantics<parallel>], iteration_bounds = array<i64: 1>, scalar_prefetch = 0 : i64, scratch_operands = 0 : i64, tpu.core_type = #tpu.core_type<tc>, window_params = [{transform_indices = @transform_0, window_bounds = array<i64: 8, 1024>}, {transform_indices = @transform_1, window_bounds = array<i64: 8, 32>}, {pipeline_mode = #tpu.pipeline_mode<synchronous>, transform_indices = @transform_2, window_bounds = array<i64: 1024, 32>}, {pipeline_mode = #tpu.pipeline_mode<synchronous>, transform_indices = @transform_3, window_bounds = array<i64: 1, 32>}, {transform_indices = @transform_4, window_bounds = array<i64: 1, 1>}, {transform_indices = @transform_5, window_bounds = array<i64: 8, 1>}]} {
    %c0 = arith.constant 0 : index
    %c0_0 = arith.constant 0 : index
    %0 = vector.load %arg1[%c0, %c0_0] : memref<8x1024xf32, #tpu.memory_space<vmem>>, vector<8x1024xf32>
    %1 = arith.truncf %0 : vector<8x1024xf32> to vector<8x1024xbf16>
    %c0_1 = arith.constant 0 : index
    %c0_2 = arith.constant 0 : index
    %2 = vector.load %arg3[%c0_1, %c0_2] : memref<1024x32xbf16, #tpu.memory_space<vmem>>, vector<1024x32xbf16>
    %cst = arith.constant dense<0.000000e+00> : vector<8x32xf32>
    %3 = tpu.matmul %1, %2, %cst {dimension_numbers = #tpu.dot_dimension_numbers<[1], [0], [0], [1], [0, 0, 1, 1], [], []>} : vector<8x1024xbf16>, vector<1024x32xbf16>, vector<8x32xf32> -> vector<8x32xf32>
    %c0_3 = arith.constant 0 : index
    %c0_4 = arith.constant 0 : index
    %4 = vector.load %arg2[%c0_3, %c0_4] : memref<8x32xf32, #tpu.memory_space<vmem>>, vector<8x32xf32>
    %5 = arith.addf %3, %4 : vector<8x32xf32>
    %cst_5 = arith.constant 0.000000e+00 : f32
    %6 = vector.broadcast %cst_5 : f32 to vector<8x32xf32>
    %7 = arith.maximumf %5, %6 : vector<8x32xf32>
    %c0_6 = arith.constant 0 : index
    %c0_7 = arith.constant 0 : index
    %8 = vector.load %arg4[%c0_6, %c0_7] : memref<1x32xf32, #tpu.memory_space<vmem>>, vector<1x32xf32>
    %9 = vector.broadcast %8 : vector<1x32xf32> to vector<8x32xf32>
    %10 = arith.mulf %7, %9 : vector<8x32xf32>
    %cst_8 = arith.constant dense<0.000000e+00> : vector<8xf32>
    %11 = vector.multi_reduction <add>, %10, %cst_8 [1] : vector<8x32xf32> to vector<8xf32>
    %12 = vector.shape_cast %11 : vector<8xf32> to vector<8x1xf32>
    %c0_9 = arith.constant 0 : index
    %c0_10 = arith.constant 0 : index
    %13 = memref.load %arg5[%c0_9, %c0_10] : memref<1x1xf32, #tpu.memory_space<smem>>
    %14 = vector.broadcast %13 : f32 to vector<8x1xf32>
    %15 = arith.addf %12, %14 : vector<8x1xf32>
    %c0_11 = arith.constant 0 : index
    %c0_12 = arith.constant 0 : index
    %16 = vector.load %arg6[%c0_11, %c0_12] : memref<8x1xf32, #tpu.memory_space<vmem>>, vector<8x1xf32>
    tpu.vector_store %arg6[%c0_11, %c0_12], %15 {strides = array<i32>} : memref<8x1xf32, #tpu.memory_space<vmem>>, vector<8x1xf32>,
    return
  }
  func.func @transform_0(%arg0: i32) -> (i32, i32) {
    %c0_i32 = arith.constant 0 : i32
    %c0_i32_0 = arith.constant 0 : i32
    return %arg0, %c0_i32 : i32, i32
  }
  func.func @transform_1(%arg0: i32) -> (i32, i32) {
    %c0_i32 = arith.constant 0 : i32
    %c0_i32_0 = arith.constant 0 : i32
    return %arg0, %c0_i32 : i32, i32
  }
  func.func @transform_2(%arg0: i32) -> (i32, i32) {
    %c0_i32 = arith.constant 0 : i32
    %c0_i32_0 = arith.constant 0 : i32
    %c0_i32_1 = arith.constant 0 : i32
    return %c0_i32, %c0_i32_0 : i32, i32
  }
  func.func @transform_3(%arg0: i32) -> (i32, i32) {
    %c0_i32 = arith.constant 0 : i32
    %c0_i32_0 = arith.constant 0 : i32
    %c0_i32_1 = arith.constant 0 : i32
    return %c0_i32, %c0_i32_0 : i32, i32
  }
  func.func @transform_4(%arg0: i32) -> (i32, i32) {
    %c0_i32 = arith.constant 0 : i32
    %c0_i32_0 = arith.constant 0 : i32
    %c0_i32_1 = arith.constant 0 : i32
    return %c0_i32, %c0_i32_0 : i32, i32
  }
  func.func @transform_5(%arg0: i32) -> (i32, i32) {
    %c0_i32 = arith.constant 0 : i32
    %c0_i32_0 = arith.constant 0 : i32
    return %arg0, %c0_i32 : i32, i32
  }
}

</mosaic_0001>

<bundles_post_ra>
// kernel: tpu_custom_call.1
= control target key start
LH: loop header
LB: loop body
LE: loop exit
PB: predicated region body
PF: predicated region fallthrough
CT: control target
= control target key end

     0   :  { %vm720_vm0 = vcmask 261120   ;;  %vm727_vm1 = vcmask 7168   ;;  %s1208_s2 = inlined_call_operand.vmem [shape: bf16[1024,32], index: 2, kind: input, shape index: {}]   ;;  %s1209_s0 = inlined_call_operand.vmem [shape: f32[8,1024], index: 0, kind: input, shape index: {}]   ;;  %s1210_s1 = inlined_call_operand.vmem [shape: f32[8,32], index: 1, kind: input, shape index: {}]   ;;  %s1211_s3 = inlined_call_operand.vmem [shape: f32[1,32], index: 3, kind: input, shape index: {}]   ;;  %s1212_s4 = inlined_call_operand.<no memory space> [shape: f32[1,1], index: 4, kind: input, shape index: {}]   ;;  %s1213_s5 = inlined_call_operand.vmem [shape: f32[8,1], index: 5, kind: output, shape index: {}]  }
   0x1   :  { %v886_v0 = vld [vmem:[%s1208_s2 + $0x40] sm:$0xff]   ;;  %v890_v4 = vld [vmem:[%s1208_s2 + $0x48] sm:$0xff]   ;;  %v894_v8 = vld [vmem:[%s1208_s2 + $0x50] sm:$0xff]  }
   0x2   :  { %v887_v1 = vld [vmem:[%s1208_s2 + $0xc0] sm:$0xff]   ;;  %798 = vmatprep.subr.bf16.mxu0 %v886_v0  ;;  %v891_v5 = vld [vmem:[%s1208_s2 + $0xc8] sm:$0xff]   ;;  %v895_v9 = vld [vmem:[%s1208_s2 + $0xd0] sm:$0xff]  }
   0x3   :  { %v888_v2 = vld [vmem:[%s1208_s2] sm:$0xff]   ;;  %820 = vmatprep.subr.bf16.mxu1 %v887_v1  ;;  %v892_v6 = vld [vmem:[%s1208_s2 + $0x8] sm:$0xff]   ;;  %v896_v10 = vld [vmem:[%s1208_s2 + $0x10] sm:$0xff]  }
   0x4   :  { %v889_v3 = vld [vmem:[%s1208_s2 + $0x80] sm:$0xff]   ;;  %799 = vmatpush3.bf16.msra.mxu0 %v888_v2  ;;  %v893_v7 = vld [vmem:[%s1208_s2 + $0x88] sm:$0xff]   ;;  %v897_v11 = vld [vmem:[%s1208_s2 + $0x90] sm:$0xff]  }
   0x5   :  { %821 = vmatpush3.bf16.msra.mxu1 %v889_v3  ;;  %800 = vmatprep.subr.bf16.mxu0 %v890_v4  ;;  %v898_v12 = vld [vmem:[%s1208_s2 + $0x58] sm:$0xff]   ;;  %v902_v16 = vld [vmem:[%s1208_s2 + $0x60] sm:$0xff]   ;;  %v906_v20 = vld [vmem:[%s1208_s2 + $0x68] sm:$0xff]  }
   0x6   :  { %822 = vmatprep.subr.bf16.mxu1 %v891_v5  ;;  %v899_v13 = vld [vmem:[%s1208_s2 + $0xd8] sm:$0xff]   ;;  %v903_v17 = vld [vmem:[%s1208_s2 + $0xe0] sm:$0xff]   ;;  %v907_v21 = vld [vmem:[%s1208_s2 + $0xe8] sm:$0xff]  }
   0x7   :  { %v900_v14 = vld [vmem:[%s1208_s2 + $0x18] sm:$0xff]   ;;  %v904_v18 = vld [vmem:[%s1208_s2 + $0x20] sm:$0xff]   ;;  %v908_v22 = vld [vmem:[%s1208_s2 + $0x28] sm:$0xff]  }
   0x8   :  { %801 = vmatpush3.bf16.msra.mxu0 %v892_v6  ;;  %v901_v15 = vld [vmem:[%s1208_s2 + $0x98] sm:$0xff]   ;;  %v905_v19 = vld [vmem:[%s1208_s2 + $0xa0] sm:$0xff]   ;;  %v909_v23 = vld [vmem:[%s1208_s2 + $0xa8] sm:$0xff]  }
   0x9   :  { %823 = vmatpush3.bf16.msra.mxu1 %v893_v7  ;;  %802 = vmatprep.subr.bf16.mxu0 %v894_v8  ;;  %v910_v24 = vld [vmem:[%s1208_s2 + $0x70] sm:$0xff]   ;;  %v914_v28 = vld [vmem:[%s1208_s2 + $0x78] sm:$0xff]   ;;  %v23_v32 = vld [vmem:[%s1209_s0 + $0x8] sm:$0xff] }
   0xa   :  { %824 = vmatprep.subr.bf16.mxu1 %v895_v9  ;;  %v911_v25 = vld [vmem:[%s1208_s2 + $0xf0] sm:$0xff]   ;;  %v915_v29 = vld [vmem:[%s1208_s2 + $0xf8] sm:$0xff]   ;;  %v22_v34 = vld [vmem:[%s1209_s0] sm:$0xff]  ;;  %v31_v35 = vpack.c.bf16 %v23_v32, %v23_v32 }
   0xb   :  { %v912_v26 = vld [vmem:[%s1208_s2 + $0x30] sm:$0xff]   ;;  %v916_v30 = vld [vmem:[%s1208_s2 + $0x38] sm:$0xff]   ;;  %v30_v37 = vpack.c.bf16 %v22_v34, %v22_v34  ;;  %v918_v40 = vld [vmem:[%s1208_s2 + $0x140] sm:$0xff]  }
   0xc   :  { %803 = vmatpush3.bf16.msra.mxu0 %v896_v10  ;;  %v913_v27 = vld [vmem:[%s1208_s2 + $0xb0] sm:$0xff]   ;;  %v917_v31 = vld [vmem:[%s1208_s2 + $0xb8] sm:$0xff]   ;;  %583 = vmatprep.mubr.bf16.mxu0 %v31_v35  ;;  %v919_v41 = vld [vmem:[%s1208_s2 + $0x1c0] sm:$0xff]  }
   0xd   :  { %825 = vmatpush3.bf16.msra.mxu1 %v897_v11  ;;  %804 = vmatprep.subr.bf16.mxu0 %v898_v12  ;;  %v25_v33 = vld [vmem:[%s1209_s0 + $0x18] sm:$0xff]  ;;  %v24_v38 = vld [vmem:[%s1209_s0 + $0x10] sm:$0xff]  ;;  %v920_v42 = vld [vmem:[%s1208_s2 + $0x100] sm:$0xff]  }
   0xe   :  { %826 = vmatprep.subr.bf16.mxu1 %v899_v13  ;;  %v33_v36 = vpack.c.bf16 %v25_v33, %v25_v33  ;;  %v32_v39 = vpack.c.bf16 %v24_v38, %v24_v38  ;;  %v921_v43 = vld [vmem:[%s1208_s2 + $0x180] sm:$0xff]   ;;  %v922_v44 = vld [vmem:[%s1208_s2 + $0x148] sm:$0xff]   ;;  %v926_v48 = vld [vmem:[%s1208_s2 + $0x150] sm:$0xff]  }
   0xf   :  { %v923_v45 = vld [vmem:[%s1208_s2 + $0x1c8] sm:$0xff]   ;;  %v927_v49 = vld [vmem:[%s1208_s2 + $0x1d0] sm:$0xff]   ;;  %v930_v52 = vld [vmem:[%s1208_s2 + $0x158] sm:$0xff]  }
  0x10   :  { %805 = vmatpush3.bf16.msra.mxu0 %v900_v14  ;;  %623 = vmatprep.mubr.bf16.mxu1 %v33_v36  ;;  %v924_v46 = vld [vmem:[%s1208_s2 + $0x108] sm:$0xff]   ;;  %v928_v50 = vld [vmem:[%s1208_s2 + $0x110] sm:$0xff]   ;;  %v931_v53 = vld [vmem:[%s1208_s2 + $0x1d8] sm:$0xff]  }
  0x11   :  { %827 = vmatpush3.bf16.msra.mxu1 %v901_v15  ;;  %806 = vmatprep.subr.bf16.mxu0 %v902_v16  ;;  %v925_v47 = vld [vmem:[%s1208_s2 + $0x188] sm:$0xff]   ;;  %v929_v51 = vld [vmem:[%s1208_s2 + $0x190] sm:$0xff]   ;;  %v932_v54 = vld [vmem:[%s1208_s2 + $0x118] sm:$0xff]  }
  0x12   :  { %828 = vmatprep.subr.bf16.mxu1 %v903_v17  ;;  %v933_v55 = vld [vmem:[%s1208_s2 + $0x198] sm:$0xff]   ;;  %v934_v56 = vld [vmem:[%s1208_s2 + $0x160] sm:$0xff]   ;;  %v938_v60 = vld [vmem:[%s1208_s2 + $0x168] sm:$0xff]  }
  0x13   :  { %v935_v57 = vld [vmem:[%s1208_s2 + $0x1e0] sm:$0xff]   ;;  %v939_v61 = vld [vmem:[%s1208_s2 + $0x1e8] sm:$0xff]   ;;  %v942_v0 = vld [vmem:[%s1208_s2 + $0x170] sm:$0xff]  }
  0x14   :  { %807 = vmatpush3.bf16.msra.mxu0 %v904_v18  ;;  %v936_v58 = vld [vmem:[%s1208_s2 + $0x120] sm:$0xff]   ;;  %v940_v62 = vld [vmem:[%s1208_s2 + $0x128] sm:$0xff]   ;;  %v943_v1 = vld [vmem:[%s1208_s2 + $0x1f0] sm:$0xff]  }
  0x15   :  { %829 = vmatpush3.bf16.msra.mxu1 %v905_v19  ;;  %808 = vmatprep.subr.bf16.mxu0 %v906_v20  ;;  %v937_v59 = vld [vmem:[%s1208_s2 + $0x1a0] sm:$0xff]   ;;  %v941_v63 = vld [vmem:[%s1208_s2 + $0x1a8] sm:$0xff]   ;;  %v944_v2 = vld [vmem:[%s1208_s2 + $0x130] sm:$0xff]  }
  0x16   :  { %830 = vmatprep.subr.bf16.mxu1 %v907_v21  ;;  %v945_v3 = vld [vmem:[%s1208_s2 + $0x1b0] sm:$0xff]   ;;  %v946_v4 = vld [vmem:[%s1208_s2 + $0x178] sm:$0xff]   ;;  %v27_v8 = vld [vmem:[%s1209_s0 + $0x28] sm:$0xff] }
  0x17   :  { %v947_v5 = vld [vmem:[%s1208_s2 + $0x1f8] sm:$0xff]   ;;  %v35_v10 = vpack.c.bf16 %v27_v8, %v27_v8  ;;  %v26_v12 = vld [vmem:[%s1209_s0 + $0x20] sm:$0xff]  ;;  %v28_v13 = vld [vmem:[%s1209_s0 + $0x30] sm:$0xff] }
  0x18   :  { %809 = vmatpush3.bf16.msra.mxu0 %v908_v22  ;;  %v948_v6 = vld [vmem:[%s1208_s2 + $0x138] sm:$0xff]   ;;  %v34_v14 = vpack.c.bf16 %v26_v12, %v26_v12  ;;  %v36_v15 = vpack.c.bf16 %v28_v13, %v28_v13  ;;  %v166_v18 = vld [vmem:[%s1210_s1] sm:$0xff] }
  0x19   :  { %831 = vmatpush3.bf16.msra.mxu1 %v909_v23  ;;  %810 = vmatprep.subr.bf16.mxu0 %v910_v24  ;;  %v949_v7 = vld [vmem:[%s1208_s2 + $0x1b8] sm:$0xff]  }
  0x1a   :  { %832 = vmatprep.subr.bf16.mxu1 %v911_v25  ;;  %v29_v9 = vld [vmem:[%s1209_s0 + $0x38] sm:$0xff] }
  0x1b   :  { %v37_v11 = vpack.c.bf16 %v29_v9, %v29_v9 }
  0x1c   :  { %811 = vmatpush3.bf16.msra.mxu0 %v912_v26 }
  0x1d   :  { %833 = vmatpush3.bf16.msra.mxu1 %v913_v27  ;;  %812 = vmatprep.subr.bf16.mxu0 %v914_v28 }
  0x1e   :  { %834 = vmatprep.subr.bf16.mxu1 %v915_v29 }
  0x20   :  { %813 = vmatpush3.bf16.msra.mxu0 %v916_v30 }
  0x21   :  { %835 = vmatpush3.bf16.msra.mxu1 %v917_v31  ;;  %842 = vmatprep.subr.bf16.mxu0 %v918_v40 }
  0x22   :  { %864 = vmatprep.subr.bf16.mxu1 %v919_v41  ;;  %v797_v41 = vld [vmem:[%s1211_s3] ss:$0 sm:$0xff] }
  0x23   :  { %584 = vmatmul.mubr.bf16.vlgmr.msra.gmra.mrb[0].mxu0 %v30_v37 }
  0x24   :  { %624 = vmatmul.mubr.bf16.vlgmr.msra.gmra.mrb[0].mxu1 %v32_v39  ;;  %843 = vmatpush3.bf16.msra.mxu0 %v920_v42 }
  0x25   :  { %865 = vmatpush3.bf16.msra.mxu1 %v921_v43  ;;  %844 = vmatprep.subr.bf16.mxu0 %v922_v44 }
  0x26   :  { %866 = vmatprep.subr.bf16.mxu1 %v923_v45  ;;  %663 = vmatprep.mubr.bf16.mxu0 %v35_v10  ;;  %v725_v45 = vstv %s1212_s4 }
  0x27   :  { %703 = vmatprep.mubr.bf16.mxu1 %v37_v11 }
  0x28   :  { %845 = vmatpush3.bf16.msra.mxu0 %v924_v46 }
  0x29   :  { %867 = vmatpush3.bf16.msra.mxu1 %v925_v47  ;;  %846 = vmatprep.subr.bf16.mxu0 %v926_v48 }
  0x2a   :  { %868 = vmatprep.subr.bf16.mxu1 %v927_v49 }
  0x2c   :  { %847 = vmatpush3.bf16.msra.mxu0 %v928_v50 }
  0x2d   :  { %869 = vmatpush3.bf16.msra.mxu1 %v929_v51  ;;  %848 = vmatprep.subr.bf16.mxu0 %v930_v52 }
  0x2e   :  { %870 = vmatprep.subr.bf16.mxu1 %v931_v53 }
  0x30   :  { %849 = vmatpush3.bf16.msra.mxu0 %v932_v54 }
  0x31   :  { %871 = vmatpush3.bf16.msra.mxu1 %v933_v55  ;;  %850 = vmatprep.subr.bf16.mxu0 %v934_v56 }
  0x32   :  { %872 = vmatprep.subr.bf16.mxu1 %v935_v57 }
  0x34   :  { %851 = vmatpush3.bf16.msra.mxu0 %v936_v58 }
  0x35   :  { %873 = vmatpush3.bf16.msra.mxu1 %v937_v59  ;;  %852 = vmatprep.subr.bf16.mxu0 %v938_v60 }
  0x36   :  { %874 = vmatprep.subr.bf16.mxu1 %v939_v61 }
  0x38   :  { %853 = vmatpush3.bf16.msra.mxu0 %v940_v62 }
  0x39   :  { %875 = vmatpush3.bf16.msra.mxu1 %v941_v63  ;;  %854 = vmatprep.subr.bf16.mxu0 %v942_v0 }
  0x3a   :  { %876 = vmatprep.subr.bf16.mxu1 %v943_v1 }
  0x3c   :  { %855 = vmatpush3.bf16.msra.mxu0 %v944_v2 }
  0x3d   :  { %877 = vmatpush3.bf16.msra.mxu1 %v945_v3  ;;  %856 = vmatprep.subr.bf16.mxu0 %v946_v4 }
  0x3e   :  { %878 = vmatprep.subr.bf16.mxu1 %v947_v5 }
  0x40   :  { %857 = vmatpush3.bf16.msra.mxu0 %v948_v6 }
  0x41   :  { %879 = vmatpush3.bf16.msra.mxu1 %v949_v7 }
  0x43   :  { %664 = vmatmul.mubr.bf16.vlgmr.msra.gmra.mrb[4].mxu0 %v34_v14 }
  0x44   :  { %704 = vmatmul.mubr.bf16.vlgmr.msra.gmra.mrb[4].mxu1 %v36_v15 }
  0xf6   :  { %v814_v16 = vpop.f32.mrb[0].mxu0 }
  0xf7   :  { %v836_v17 = vpop.f32.mrb[0].mxu1  ;;  %v815_v19 = vpop.f32.mrb[1].mxu0 }
  0xf8   :  { %v837_v20 = vpop.f32.mrb[1].mxu1  ;;  %v816_v21 = vadd.f32 %v815_v19, %v814_v16  ;;  %v817_v23 = vpop.f32.mrb[2].mxu0 }
  0xf9   :  { %v838_v22 = vadd.f32 %v837_v20, %v836_v17  ;;  %v839_v24 = vpop.f32.mrb[2].mxu1  ;;  %v818_v25 = vpop.f32.mrb[3].mxu0 }
  0xfa   :  { %v840_v26 = vpop.f32.mrb[3].mxu1  ;;  %v586_v27 = vadd.f32 %v816_v21, %v166_v18 }
  0xfc   :  { %v626_v28 = vadd.f32 %v838_v22, %v586_v27 }
 0x116   :  { %v858_v29 = vpop.f32.mrb[4].mxu0 }
 0x117   :  { %v880_v30 = vpop.f32.mrb[4].mxu1  ;;  %v859_v31 = vpop.f32.mrb[5].mxu0 }
 0x118   :  { %v860_v32 = vadd.f32 %v859_v31, %v858_v29  ;;  %v881_v33 = vpop.f32.mrb[5].mxu1  ;;  %v861_v34 = vpop.f32.mrb[6].mxu0 }
 0x119   :  { %v882_v35 = vadd.f32 %v881_v33, %v880_v30  ;;  %v883_v36 = vpop.f32.mrb[6].mxu1  ;;  %v862_v37 = vpop.f32.mrb[7].mxu0 }
 0x11a   :  { %v666_v38 = vadd.f32 %v860_v32, %v626_v28  ;;  %v884_v39 = vpop.f32.mrb[7].mxu1 }
 0x11c   :  { %v706_v40 = vadd.f32 %v882_v35, %v666_v38 }
 0x11e   :  { %v711_v42 = vmax.f32 %v706_v40, 0.0 }
 0x120   :  { %v719_v43 = vmul.f32 %v797_v41, %v711_v42 }
 0x122   :  { %v721_v44 = vsel %vm720_vm0, %v719_v43, 0.0 }
 0x123   :  { %722 = vadd.xlane.f32.xlu0 %v721_v44 }
 0x1b0   :  { %v723_v46 = vpop.xlane.xlu0 %722 }
 0x1b1   :  { %v726_v47 = vadd.f32 %v725_v45, %v723_v46 }
 0x1b3   :  { %728 = vst.msk [vmem:[%s1213_s5] sm:$0xff] %vm727_vm1, %v726_v47 }

</bundles_post_ra>
